<compile_context>
chip_gen: v6e
topology: v6e:2x2x1
jax: 0.10.0
libtpu: 0.0.40
codegen_flags: <defaults>
</compile_context>

<pallas_src>
import functools

import jax
import jax.numpy as jnp
from jax.experimental import pallas as pl
from jax.experimental.pallas import tpu as pltpu


def _focal_loss_kernel(logits_ref, targets_ref, *rest, gamma, n_rows, tile_n,
                       has_alpha):
    if has_alpha:
        alpha_ref, out_ref = rest
    else:
        (out_ref,) = rest

    i = pl.program_id(0)

    x = logits_ref[...].astype(jnp.float32)        # (TILE_N, C)
    t = targets_ref[...]                           # (TILE_N, 1) int32
    tn, c = x.shape

    # Numerically-stable log-sum-exp over the class axis.  Padded rows of the
    # ragged last tile may hold garbage; exp(x - rowmax) <= 1 so nothing
    # overflows, and any per-row NaN/Inf is zeroed by the final select.
    m = jnp.max(x, axis=-1, keepdims=True)         # (TILE_N, 1)
    e = jnp.exp(x - m)                             # (TILE_N, C)
    s = jnp.sum(e, axis=-1, keepdims=True)         # (TILE_N, 1)
    lse = jnp.log(s) + m                           # (TILE_N, 1)

    # Target gather via a boolean one-hot mask + select (no cast, no mul).
    cls_ids = jax.lax.broadcasted_iota(jnp.int32, (tn, c), 1)
    onehot = cls_ids == t                          # (TILE_N, C) bool
    x_t = jnp.sum(jnp.where(onehot, x, 0.0), axis=-1, keepdims=True)
    nll = lse - x_t                                # -log p_target

    if has_alpha:
        a = alpha_ref[...].astype(jnp.float32)     # (1, C)
        w = jnp.sum(jnp.where(onehot, a, 0.0), axis=-1, keepdims=True)
        ce = w * nll                               # reduction='none' + weight
    else:
        ce = nll
    pt = jnp.exp(-ce)                              # single per-row EUP exp

    focal = ((1.0 - pt) ** gamma) * ce             # (TILE_N, 1)

    # Ragged last tile: zero out-of-range rows, then reduce to one scalar.
    row_ids = jax.lax.broadcasted_iota(jnp.int32, (tn, 1), 0) + i * tile_n
    valid = row_ids < n_rows
    out_ref[0, 0] = jnp.sum(jnp.where(valid, focal, 0.0))


def _choose_tile_n(n, c, itemsize):
    """Largest row tile whose estimated VMEM working set stays <= ~24 MiB.

    Counts: double-buffered logits slab (lane-padded C), double-buffered
    lane-padded (TILE_N, 128) int32 targets tile, and ~18 B/element of live
    f32 (TILE_N, C_pad) intermediates (x, e, one-hot selects, ...).
    ~24 MiB keeps headroom inside v7x's 64 MiB physical VMEM; v5e/v6e
    (128 MiB) get the same large tiles, which is what they need to amortize
    the ~0.35 us per-grid-step pipeline overhead.
    """
    budget = 24 * 1024 * 1024
    c_pad = ((c + 127) // 128) * 128
    per_row = c_pad * (2 * itemsize + 18) + 2 * 128 * 4
    t = budget // max(1, per_row)
    t = min(t, 16384)                  # review: 8-16K rows is plenty
    if t >= n:
        return n                       # single tile: block == full array is legal
    return max(8, (t // 8) * 8)        # multi-tile: keep sublane-aligned


def focal_loss(logits, targets, alpha=None, gamma=2, tile_n=None):
    """Pallas FocalLoss forward. logits: (N, C) float; targets: (N,) int."""
    n, c = logits.shape
    targets2d = targets.astype(jnp.int32).reshape(n, 1)

    if tile_n is None:
        tile_n = _choose_tile_n(n, c, logits.dtype.itemsize)
    tile_n = min(tile_n, n)
    if tile_n < n:
        tile_n = max(8, (tile_n // 8) * 8)
    num_tiles = pl.cdiv(n, tile_n)

    has_alpha = alpha is not None
    in_specs = [
        pl.BlockSpec((tile_n, c), lambda i: (i, 0)),   # logits tile
        pl.BlockSpec((tile_n, 1), lambda i: (i, 0)),   # targets tile
    ]
    args = [logits, targets2d]                          # no f32 upcast at call site
    if has_alpha:
        alpha_arr = jnp.asarray(alpha, jnp.float32).reshape(1, c)
        in_specs.append(pl.BlockSpec((1, c), lambda i: (0, 0)))
        args.append(alpha_arr)

    kernel = functools.partial(
        _focal_loss_kernel, gamma=gamma, n_rows=n, tile_n=tile_n,
        has_alpha=has_alpha)

    bytes_accessed = (n * c * logits.dtype.itemsize + n * 4
                      + (c * 4 if has_alpha else 0) + num_tiles * 4)
    cost = pl.CostEstimate(flops=8 * n * c,
                           transcendentals=n * (c + 1),
                           bytes_accessed=bytes_accessed)

    partials = pl.pallas_call(
        kernel,
        out_shape=jax.ShapeDtypeStruct((num_tiles, 1), jnp.float32),
        grid=(num_tiles,),
        in_specs=in_specs,
        # One scalar partial per grid step -> independent output blocks, so
        # the grid axis can be "parallel" (both TCs on v7x; harmless on 1-TC).
        out_specs=pl.BlockSpec((1, 1), lambda i: (i, 0),
                               memory_space=pltpu.MemorySpace.SMEM),
        compiler_params=pltpu.CompilerParams(
            dimension_semantics=("parallel",),
            vmem_limit_bytes=48 * 1024 * 1024,   # < v7x 64 MiB physical, ample on v5e/v6e
        ),
        cost_estimate=cost,
    )(*args)

    # Final reduce + mean over the tiny partials vector in plain JAX.
    return jnp.sum(partials) / jnp.float32(n)


def _focal_loss_ref(logits, targets, alpha=None, gamma=2):
    """Pure-JAX reference matching the PyTorch semantics."""
    logp = jax.nn.log_softmax(logits.astype(jnp.float32), axis=-1)
    nll = -jnp.take_along_axis(logp, targets[:, None].astype(jnp.int32), axis=-1)[:, 0]
    if alpha is not None:
        w = jnp.asarray(alpha, jnp.float32)[targets]
        ce = w * nll
    else:
        ce = nll
    pt = jnp.exp(-ce)
    return jnp.mean(((1.0 - pt) ** gamma) * ce)


if __name__ == "__main__":
    key = jax.random.PRNGKey(0)
    k1, k2, k3, k4 = jax.random.split(key, 4)

    # Case 1: module defaults (alpha=None, gamma=2), small batch / 4 classes.
    N1, C1 = 8, 4
    logits1 = jax.random.normal(k1, (N1, C1), dtype=jnp.float32)
    targets1 = jax.random.randint(k2, (N1,), 0, C1, dtype=jnp.int32)
    out1 = jax.block_until_ready(focal_loss(logits1, targets1, alpha=None, gamma=2))
    ref1 = _focal_loss_ref(logits1, targets1, alpha=None, gamma=2)
    assert jnp.allclose(out1, ref1, rtol=1e-5, atol=1e-6), (out1, ref1)

    # Case 2: multi-tile grid, ragged last tile, per-class alpha, bf16 logits.
    N2, C2 = 300, 16
    logits2 = jax.random.normal(k3, (N2, C2), dtype=jnp.float32).astype(jnp.bfloat16)
    targets2 = jax.random.randint(k4, (N2,), 0, C2, dtype=jnp.int32)
    alpha2 = jnp.linspace(0.5, 1.5, C2, dtype=jnp.float32)
    out2 = jax.block_until_ready(
        focal_loss(logits2, targets2, alpha=alpha2, gamma=2, tile_n=128))
    ref2 = _focal_loss_ref(logits2.astype(jnp.float32), targets2, alpha=alpha2, gamma=2)
    assert jnp.allclose(out2, ref2, rtol=1e-4, atol=1e-5), (out2, ref2)

    # Case 3: auto tile sizing path (no explicit tile_n), alpha=None.
    N3, C3 = 1000, 8
    logits3 = jax.random.normal(k1, (N3, C3), dtype=jnp.float32)
    targets3 = jax.random.randint(k2, (N3,), 0, C3, dtype=jnp.int32)
    out3 = jax.block_until_ready(focal_loss(logits3, targets3, alpha=None, gamma=2))
    ref3 = _focal_loss_ref(logits3, targets3, alpha=None, gamma=2)
    assert jnp.allclose(out3, ref3, rtol=1e-5, atol=1e-6), (out3, ref3)

    print("KERNEL_OK")
</pallas_src>

<mosaic_0001>
module attributes {stable_mosaic.version = 11 : i64} {
  func.func @_focal_loss_kernel(%arg0: i32, %arg1: memref<8x4xf32, #tpu.memory_space<vmem>>, %arg2: memref<8x1xi32, #tpu.memory_space<vmem>>, %arg3: memref<1x1xf32, #tpu.memory_space<smem>>) attributes {dimension_semantics = [#tpu.dimension_semantics<parallel>], iteration_bounds = array<i64: 1>, scalar_prefetch = 0 : i64, scratch_operands = 0 : i64, tpu.core_type = #tpu.core_type<tc>, window_params = [{transform_indices = @transform_0, window_bounds = array<i64: 8, 4>}, {transform_indices = @transform_1, window_bounds = array<i64: 8, 1>}, {transform_indices = @transform_2, window_bounds = array<i64: 1, 1>}]} {
    %c0 = arith.constant 0 : index
    %c0_0 = arith.constant 0 : index
    %0 = vector.load %arg1[%c0, %c0_0] : memref<8x4xf32, #tpu.memory_space<vmem>>, vector<8x4xf32>
    %c0_1 = arith.constant 0 : index
    %c0_2 = arith.constant 0 : index
    %1 = vector.load %arg2[%c0_1, %c0_2] : memref<8x1xi32, #tpu.memory_space<vmem>>, vector<8x1xi32>
    %cst = arith.constant dense<0xFF800000> : vector<8xf32>
    %2 = vector.multi_reduction <maximumf>, %0, %cst [1] : vector<8x4xf32> to vector<8xf32>
    %3 = vector.shape_cast %2 : vector<8xf32> to vector<8x1xf32>
    %4 = vector.broadcast %3 : vector<8x1xf32> to vector<8x4xf32>
    %5 = arith.subf %0, %4 : vector<8x4xf32>
    %6 = math.exp %5 : vector<8x4xf32>
    %cst_3 = arith.constant dense<0.000000e+00> : vector<8xf32>
    %7 = vector.multi_reduction <add>, %6, %cst_3 [1] : vector<8x4xf32> to vector<8xf32>
    %8 = vector.shape_cast %7 : vector<8xf32> to vector<8x1xf32>
    %9 = math.log %8 : vector<8x1xf32>
    %10 = arith.addf %9, %3 : vector<8x1xf32>
    %11 = tpu.iota {dimensions = array<i32: 1>} : vector<8x4xi32>
    %12 = vector.broadcast %1 : vector<8x1xi32> to vector<8x4xi32>
    %13 = arith.cmpi eq, %11, %12 : vector<8x4xi32>
    %cst_4 = arith.constant 0.000000e+00 : f32
    %14 = vector.broadcast %cst_4 : f32 to vector<8x4xf32>
    %15 = arith.select %13, %0, %14 : vector<8x4xi1>, vector<8x4xf32>
    %cst_5 = arith.constant dense<0.000000e+00> : vector<8xf32>
    %16 = vector.multi_reduction <add>, %15, %cst_5 [1] : vector<8x4xf32> to vector<8xf32>
    %17 = vector.shape_cast %16 : vector<8xf32> to vector<8x1xf32>
    %18 = arith.subf %10, %17 : vector<8x1xf32>
    %cst_6 = arith.constant 0.000000e+00 : f32
    %19 = vector.broadcast %cst_6 : f32 to vector<8x1xf32>
    %20 = arith.subf %19, %18 : vector<8x1xf32>
    %21 = math.exp %20 : vector<8x1xf32>
    %cst_7 = arith.constant 1.000000e+00 : f32
    %22 = vector.broadcast %cst_7 : f32 to vector<8x1xf32>
    %23 = arith.subf %22, %21 : vector<8x1xf32>
    %24 = arith.mulf %23, %23 : vector<8x1xf32>
    %25 = arith.mulf %24, %18 : vector<8x1xf32>
    %26 = tpu.iota {dimensions = array<i32: 0>} : vector<8x1xi32>
    %c8_i32 = arith.constant 8 : i32
    %27 = arith.muli %arg0, %c8_i32 : i32
    %28 = vector.broadcast %27 : i32 to vector<8x1xi32>
    %29 = arith.addi %26, %28 : vector<8x1xi32>
    %c8_i32_8 = arith.constant 8 : i32
    %30 = vector.broadcast %c8_i32_8 : i32 to vector<8x1xi32>
    %31 = arith.cmpi slt, %29, %30 : vector<8x1xi32>
    %cst_9 = arith.constant 0.000000e+00 : f32
    %32 = vector.broadcast %cst_9 : f32 to vector<8x1xf32>
    %33 = arith.select %31, %25, %32 : vector<8x1xi1>, vector<8x1xf32>
    %34 = vector.shape_cast %33 : vector<8x1xf32> to vector<1x8x1xf32>
    %cst_10 = arith.constant dense<0.000000e+00> : vector<1xf32>
    %35 = vector.multi_reduction <add>, %34, %cst_10 [1, 2] : vector<1x8x1xf32> to vector<1xf32>
    %36 = vector.shape_cast %35 : vector<1xf32> to vector<1x1x1xf32>
    %37 = vector.extract %36[0, 0, 0] : f32 from vector<1x1x1xf32>
    %c0_11 = arith.constant 0 : index
    %c0_12 = arith.constant 0 : index
    %38 = memref.load %arg3[%c0_11, %c0_12] : memref<1x1xf32, #tpu.memory_space<smem>>
    memref.store %37, %arg3[%c0_11, %c0_12] : memref<1x1xf32, #tpu.memory_space<smem>>
    return
  }
  func.func @transform_0(%arg0: i32) -> (i32, i32) {
    %c0_i32 = arith.constant 0 : i32
    %c0_i32_0 = arith.constant 0 : i32
    return %arg0, %c0_i32 : i32, i32
  }
  func.func @transform_1(%arg0: i32) -> (i32, i32) {
    %c0_i32 = arith.constant 0 : i32
    %c0_i32_0 = arith.constant 0 : i32
    return %arg0, %c0_i32 : i32, i32
  }
  func.func @transform_2(%arg0: i32) -> (i32, i32) {
    %c0_i32 = arith.constant 0 : i32
    %c0_i32_0 = arith.constant 0 : i32
    return %arg0, %c0_i32 : i32, i32
  }
}

</mosaic_0001>

<bundles_post_ra>
// kernel: tpu_custom_call.1
= control target key start
LH: loop header
LB: loop body
LE: loop exit
PB: predicated region body
PF: predicated region fallthrough
CT: control target
= control target key end

     0   :  { %vm14_vm0 = vcmask 31744   ;;  %s127_s0 = inlined_call_operand.vmem [shape: f32[8,4], index: 0, kind: input, shape index: {}]   ;;  %s128_s1 = inlined_call_operand.vmem [shape: s32[8,1], index: 1, kind: input, shape index: {}]   ;;  %s129_s2 = inlined_call_operand.hbm [shape: f32[1,1], index: 2, kind: output, shape index: {}]  }
   0x1   :  { %v12_v0 = vld [vmem:[%s127_s0] sm:$0xff] }
   0x2   :  { %7 = vsyncpa [#allocation3], 0  ;;  %v15_v1 = vsel %vm14_vm0, %v12_v0, -inf  ;;  %v98_v2 = vmov 0   ;;  %v13_v3 = vld [vmem:[%s128_s1] sm:$0xff]  ;;  %v27_v7 = vlaneseq  ;;  %vm51_vm2 = vcmask 7168  }
   0x3   :  { %81 = vset.pattern.permute.xlu0 %v98_v2  ;;  %s99_s1 = smov [#allocation2]  }
   0x4   :  { %16 = vmax.xlane.f32.xlu0 %v15_v1  ;;  %v28_v8 = vand.u32 127, %v27_v7 }
  0x1a   :  { %30 = vperm.xlu0 %81, %v13_v3  }
  0x8d   :  { %v17_v4 = vpop.xlane.xlu0 %16 }
  0x8e   :  { %v18_v5 = vsub.f32 %v12_v0, %v17_v4 }
  0x90   :  { %v19_v6 = vmul.f32 1.442695, %v18_v5 }
  0x92   :  { %82 = vpow2.f32 %v19_v6 }
  0x95   :  { %v31_v9 = vpop.permute.xlu0 %30 }
  0x96   :  { %vm32_vm1 = vcmp.eq.s32.totalorder %v28_v8, %v31_v9 }
  0x97   :  { %v33_v11 = vsel %vm32_vm1, %v12_v0, 0.0 }
  0x98   :  { %v34_v13 = vsel %vm14_vm0, %v33_v11, 0.0 }
  0x9f   :  { %v83_v10 = vpop.eup %82 }
  0xa0   :  { %v21_v12 = vsel %vm14_vm0, %v83_v10, 0.0 }
  0xa1   :  { %22 = vadd.xlane.f32.xlu1 %v21_v12 }
  0xa5   :  { %35 = vadd.xlane.f32.xlu1 %v34_v13 }
 0x12a   :  { %v23_v14 = vpop.xlane.xlu1 %22 }
 0x12b   :  { %84 = vlog2.f32 %v23_v14 }
 0x12e   :  { %v36_v17 = vpop.xlane.xlu1 %35 }
 0x138   :  { %v85_v15 = vpop.eup %84 }
 0x139   :  { %v25_v16 = vmul.f32 0.6931472, %v85_v15 }
 0x13b   :  { %v26_v18 = vadd.f32 %v25_v16, %v17_v4 }
 0x13d   :  { %v37_v19 = vsub.f32 %v26_v18, %v36_v17 }
 0x13f   :  { %v38_v20 = vsub.f32 0.0, %v37_v19 }
 0x141   :  { %v39_v21 = vmul.f32 1.442695, %v38_v20 }
 0x143   :  { %86 = vpow2.f32 %v39_v21 }
 0x150   :  { %v87_v22 = vpop.eup %86 }
 0x151   :  { %v41_v23 = vsub.f32 1.0, %v87_v22 }
 0x153   :  { %v42_v24 = vmul.f32 %v41_v23, %v41_v23 }
 0x155   :  { %v43_v25 = vmul.f32 %v42_v24, %v37_v19 }
 0x157   :  { %v52_v26 = vsel %vm51_vm2, %v43_v25, 0.0 }
 0x158   :  { %53 = vadd.xlane.f32.xlu1 %v52_v26 }
 0x1e1   :  { %v54_v27 = vpop.xlane.xlu1 %53 }
 0x1e2   :  { %v55_v28 = vrot.slane %v54_v27, 4 }
 0x1e4   :  { %v56_v29 = vadd.f32 %v55_v28, %v54_v27 }
 0x1e6   :  { %v57_v30 = vrot.slane %v56_v29, 2 }
 0x1e8   :  { %v58_v31 = vadd.f32 %v57_v30, %v56_v29 }
 0x1ea   :  { %v59_v32 = vrot.slane %v58_v31, 1 }
 0x1ec   :  { %v60_v33 = vadd.f32 %v59_v32, %v58_v31 }
 0x1ee   :  { %77 = vpush %v60_v33 }
 0x21f   :  { %s78_s0 = spop %77 }
 0x220   :  { %63 = sst [smem:[#allocation2]] %s78_s0 }
 0x221   :  { %71 = dma.smem_to_hbm %s99_s1, 16, %s129_s2, [#allocation3]  }
 0x222   :  { %96 = dma.done.wait [#allocation3], 16  }
 0x223   :  { %97 = vsyncadd [#allocation3], 4294967280 }
 0x224   :  { %75 = sfence }
 0x225   :  { %76 = vsyncpa [#allocation3], 1 }

</bundles_post_ra>
